<compile_context>
chip_gen: v6e
topology: v6e:2x2x1
jax: 0.10.0
libtpu: 0.0.40
codegen_flags: <defaults>
</compile_context>

<pallas_src>
import functools

import jax
import jax.numpy as jnp
from jax import lax
from jax.experimental import pallas as pl
from jax.experimental.pallas import tpu as pltpu

K_CONV1_N = 32     # out channels of first conv
K_CONV2_N = 16     # out channels of second conv
K_DIM = 7          # conv kernel size
N_CLUSTER = 25     # in channels of icaconv_red (training path)
C_PAD = 32         # n_cluster zero-padded to a sublane-aligned channel count
LPAD = 128         # per-sample lane slab (one 128-lane tile per sample)
N_OUT = 2          # linear1 output features
BN_EPS = 1e-5


def abide_fused_kernel(x_ref, w1_ref, w2_ref, wl_ref, p1_ref, p2_ref, out_ref,
                       *, n_batch, l_in):
    x = x_ref[...]        # (32, N*128)  per-sample 128-lane slabs, zero padded
    w1 = w1_ref[...]      # (32, K*32)   k-outer / ci-inner blocks
    w2 = w2_ref[...]      # (16, K*32)
    wl = wl_ref[...]      # (2, 16)      PyTorch Linear layout (out, in)
    p1 = p1_ref[...]      # (32, 3)      columns: b1 | g1 | be1
    p2 = p2_ref[...]      # (16, 4)      columns: b2 | g2 | be2 | bl (padded col)

    nl = n_batch * LPAD
    l1 = l_in - K_DIM + 1          # conv1 valid length
    l2 = l1 - K_DIM + 1            # conv2 valid length

    b1, g1, be1 = p1[:, 0:1], p1[:, 1:2], p1[:, 2:3]
    b2, g2, be2 = p2[:, 0:1], p2[:, 1:2], p2[:, 2:3]
    bl = p2[0:N_OUT, 3:4]          # (2, 1)

    # Lane index inside each 128-lane sample slab.
    lane = jax.lax.broadcasted_iota(jnp.int32, (1, nl), 1) % LPAD

    def taps(a):
        # Roll-based im2col: tap k is an XLU lane rotation of the whole
        # (C, N*128) slab; the concat is sublane-only in 32-row aligned blocks.
        # Valid output columns (lane < l - K + 1) only ever read lanes < l1 of
        # the SAME sample, so neither the rotation wrap-around nor the padded
        # tail ever leaks into a valid column.
        return jnp.concatenate(
            [a] + [pltpu.roll(a, shift=nl - k, axis=1) for k in range(1, K_DIM)],
            axis=0)                                                 # (K*C, N*128)

    # ---- conv1 (icaconv_red): one 224-deep MXU contraction + bias + ReLU ----
    h1 = jnp.dot(w1, taps(x), preferred_element_type=jnp.float32)   # (32, N*128)
    h1 = jnp.maximum(h1 + b1, 0.0)
    valid1 = lane < l1
    h1 = jnp.where(valid1, h1, 0.0)     # zero padded lanes so BN stats stay exact

    # ---- batchnorm1 (training-mode batch stats, biased variance, two-pass) ----
    inv1 = 1.0 / (n_batch * l1)
    mean1 = jnp.sum(h1, axis=1, keepdims=True) * inv1               # (32, 1)
    diff1 = jnp.where(valid1, h1 - mean1, 0.0)
    var1 = jnp.sum(diff1 * diff1, axis=1, keepdims=True) * inv1
    a1 = g1 * lax.rsqrt(var1 + BN_EPS)
    d1 = be1 - mean1 * a1
    # Padded lanes become d1 after the affine; valid conv2 columns never read them.
    h1 = h1 * a1 + d1

    # ---- conv2: same roll-im2col + 224-deep matmul + bias + ReLU ----
    h2 = jnp.dot(w2, taps(h1), preferred_element_type=jnp.float32)  # (16, N*128)
    h2 = jnp.maximum(h2 + b2, 0.0)
    valid2 = lane < l2
    h2 = jnp.where(valid2, h2, 0.0)

    # ---- batchnorm2 stats ----
    inv2 = 1.0 / (n_batch * l2)
    mean2 = jnp.sum(h2, axis=1, keepdims=True) * inv2               # (16, 1)
    diff2 = jnp.where(valid2, h2 - mean2, 0.0)
    var2 = jnp.sum(diff2 * diff2, axis=1, keepdims=True) * inv2
    a2 = g2 * lax.rsqrt(var2 + BN_EPS)
    d2 = be2 - mean2 * a2

    # ---- AdaptiveAvgPool1d(1): 128-lane-aligned per-sample reductions; BN2
    #      affine applied to the pooled features (exact: pooling is linear) ----
    pooled = jnp.concatenate(
        [jnp.sum(h2[:, i * LPAD:(i + 1) * LPAD], axis=1, keepdims=True)
         for i in range(n_batch)], axis=1) * (1.0 / l2)             # (16, N)
    pooled = pooled * a2 + d2

    # ---- Linear(16 -> 2) ----
    out = jnp.dot(wl, pooled, preferred_element_type=jnp.float32) + bl  # (2, N)
    out_ref[...] = out.astype(out_ref.dtype)


def pack_abide_params(params):
    """One-time repack of parameters into kernel-friendly layouts (hoist per model)."""
    (w1, b1, g1, be1, w2, b2, g2, be2, wl, bl) = params
    c_in = w1.shape[1]
    # Conv weight (C_out, C_in, K) -> (C_out, K*C_pad), k-outer / ci-inner blocks,
    # matching the in-kernel roll-im2col; conv1 channels zero-padded 25 -> 32.
    w1p = jnp.pad(w1, ((0, 0), (0, C_PAD - c_in), (0, 0)))
    w1m = jnp.transpose(w1p, (0, 2, 1)).reshape(K_CONV1_N, K_DIM * C_PAD)
    w2m = jnp.transpose(w2, (0, 2, 1)).reshape(K_CONV2_N, K_DIM * K_CONV1_N)
    # Small per-channel params packed into two arrays to cut DMA-descriptor count.
    p1 = jnp.stack([b1, g1, be1], axis=1)                              # (32, 3)
    bl_col = jnp.zeros((K_CONV2_N,), jnp.float32).at[:bl.shape[0]].set(bl)
    p2 = jnp.stack([b2, g2, be2, bl_col], axis=1)                      # (16, 4)
    return w1m, w2m, wl, p1, p2


def abide1dconvnet_forward(x, ica_matrix, params, training=True):
    """x: (N, 25, L) float32 with L <= 128; returns (N, 2) float32."""
    del ica_matrix  # present in the PyTorch API; does not affect the training output
    if not training:
        # TODO(synk): eval path (icaconv_orig, 28542 input channels) needs a
        # channel-tiled grid (arbitrary contraction axis, resident accumulator,
        # vmem_limit_bytes) instead of a materialized im2col — not built here.
        raise NotImplementedError("eval path (icaconv_orig, 28542 channels) not built")
    N, c_in, L = x.shape
    assert c_in <= C_PAD and L <= LPAD, "toy-shape kernel: expects C<=32, L<=128"
    # TODO(synk): for large batches add a leading 'parallel' grid axis over sample
    # groups so both v7x TensorCores get work; grid-less is fine at N=2.

    w1m, w2m, wl, p1, p2 = pack_abide_params(params)
    # Per-sample 128-lane slab layout, channels zero-padded for sublane alignment.
    x_pad = jnp.pad(x, ((0, 0), (0, C_PAD - c_in), (0, LPAD - L)))
    x_slab = jnp.transpose(x_pad, (1, 0, 2)).reshape(C_PAD, N * LPAD)

    vmem = pl.BlockSpec(memory_space=pltpu.MemorySpace.VMEM)
    kernel = functools.partial(abide_fused_kernel, n_batch=N, l_in=L)
    out_t = pl.pallas_call(
        kernel,
        out_shape=jax.ShapeDtypeStruct((N_OUT, N), jnp.float32),
        in_specs=[vmem] * 6,
        out_specs=vmem,
    )(x_slab, w1m, w2m, wl, p1, p2)
    # Kernel emits (2, N); transpose the tiny result back to PyTorch's (N, 2).
    return out_t.T


# ---------------- pure-JAX reference (for correctness check) ----------------
def _conv1d(x, w, b):
    y = lax.conv_general_dilated(
        x, w, window_strides=(1,), padding="VALID",
        dimension_numbers=("NCH", "OIH", "NCH"),
        precision=lax.Precision.HIGHEST)
    return y + b[None, :, None]


def _bn_train(h, g, b):
    m = jnp.mean(h, axis=(0, 2), keepdims=True)
    v = jnp.mean((h - m) ** 2, axis=(0, 2), keepdims=True)
    return (h - m) / jnp.sqrt(v + BN_EPS) * g[None, :, None] + b[None, :, None]


def reference_forward(x, params):
    (w1, b1, g1, be1, w2, b2, g2, be2, wl, bl) = params
    h = jax.nn.relu(_conv1d(x, w1, b1))
    h = _bn_train(h, g1, be1)
    h = jax.nn.relu(_conv1d(h, w2, b2))
    h = _bn_train(h, g2, be2)
    pooled = jnp.mean(h, axis=2)
    return pooled @ wl.T + bl[None, :]


if __name__ == "__main__":
    key = jax.random.PRNGKey(0)
    ks = jax.random.split(key, 8)

    N, L = 2, 64
    x = jax.random.normal(ks[0], (N, N_CLUSTER, L), jnp.float32)
    # Stand-in for the (25, 28542) ICA mixing matrix — unused by the training-path output.
    ica_matrix = jax.random.normal(ks[7], (N_CLUSTER, 128), jnp.float32)

    def uinit(k, shape, fan_in):
        bound = 1.0 / (fan_in ** 0.5)
        return jax.random.uniform(k, shape, jnp.float32, -bound, bound)

    w1 = uinit(ks[1], (K_CONV1_N, N_CLUSTER, K_DIM), N_CLUSTER * K_DIM)   # icaconv_red.weight
    b1 = uinit(ks[2], (K_CONV1_N,), N_CLUSTER * K_DIM)                    # icaconv_red.bias
    g1 = jnp.ones((K_CONV1_N,), jnp.float32)                              # batchnorm1.weight
    be1 = jnp.zeros((K_CONV1_N,), jnp.float32)                            # batchnorm1.bias
    w2 = uinit(ks[3], (K_CONV2_N, K_CONV1_N, K_DIM), K_CONV1_N * K_DIM)   # conv2.weight
    b2 = uinit(ks[4], (K_CONV2_N,), K_CONV1_N * K_DIM)                    # conv2.bias
    g2 = jnp.ones((K_CONV2_N,), jnp.float32)                              # batchnorm2.weight
    be2 = jnp.zeros((K_CONV2_N,), jnp.float32)                            # batchnorm2.bias
    wl = uinit(ks[5], (2, K_CONV2_N), K_CONV2_N)                          # linear1.weight
    bl = uinit(ks[6], (2,), K_CONV2_N)                                    # linear1.bias

    params = (w1, b1, g1, be1, w2, b2, g2, be2, wl, bl)

    out = abide1dconvnet_forward(x, ica_matrix, params, training=True)
    out = jax.block_until_ready(out)

    ref = jax.block_until_ready(reference_forward(x, params))
    max_diff = float(jnp.max(jnp.abs(out - ref)))
    assert max_diff < 5e-3, f"mismatch vs reference: {max_diff}"

    print("KERNEL_OK")
</pallas_src>

<mosaic_0001>
module attributes {stable_mosaic.version = 11 : i64} {
  func.func @abide_fused_kernel(%arg0: memref<32x256xf32, #tpu.memory_space<vmem>>, %arg1: memref<32x224xf32, #tpu.memory_space<vmem>>, %arg2: memref<16x224xf32, #tpu.memory_space<vmem>>, %arg3: memref<2x16xf32, #tpu.memory_space<vmem>>, %arg4: memref<32x3xf32, #tpu.memory_space<vmem>>, %arg5: memref<16x4xf32, #tpu.memory_space<vmem>>, %arg6: memref<2x2xf32, #tpu.memory_space<vmem>>) attributes {dimension_semantics = [], scalar_prefetch = 0 : i64, scratch_operands = 0 : i64, tpu.core_type = #tpu.core_type<tc>} {
    %c0 = arith.constant 0 : index
    %c0_0 = arith.constant 0 : index
    %0 = vector.load %arg0[%c0, %c0_0] : memref<32x256xf32, #tpu.memory_space<vmem>>, vector<32x256xf32>
    %c0_1 = arith.constant 0 : index
    %c0_2 = arith.constant 0 : index
    %1 = vector.load %arg1[%c0_1, %c0_2] : memref<32x224xf32, #tpu.memory_space<vmem>>, vector<32x224xf32>
    %c0_3 = arith.constant 0 : index
    %c0_4 = arith.constant 0 : index
    %2 = vector.load %arg2[%c0_3, %c0_4] : memref<16x224xf32, #tpu.memory_space<vmem>>, vector<16x224xf32>
    %c0_5 = arith.constant 0 : index
    %c0_6 = arith.constant 0 : index
    %3 = vector.load %arg3[%c0_5, %c0_6] : memref<2x16xf32, #tpu.memory_space<vmem>>, vector<2x16xf32>
    %c0_7 = arith.constant 0 : index
    %c0_8 = arith.constant 0 : index
    %4 = vector.load %arg4[%c0_7, %c0_8] : memref<32x3xf32, #tpu.memory_space<vmem>>, vector<32x3xf32>
    %c0_9 = arith.constant 0 : index
    %c0_10 = arith.constant 0 : index
    %5 = vector.load %arg5[%c0_9, %c0_10] : memref<16x4xf32, #tpu.memory_space<vmem>>, vector<16x4xf32>
    %6 = vector.extract_strided_slice %4 {offsets = [0, 0], sizes = [32, 1], strides = [1, 1]} : vector<32x3xf32> to vector<32x1xf32>
    %7 = vector.extract_strided_slice %4 {offsets = [0, 1], sizes = [32, 1], strides = [1, 1]} : vector<32x3xf32> to vector<32x1xf32>
    %8 = vector.extract_strided_slice %4 {offsets = [0, 2], sizes = [32, 1], strides = [1, 1]} : vector<32x3xf32> to vector<32x1xf32>
    %9 = vector.extract_strided_slice %5 {offsets = [0, 0], sizes = [16, 1], strides = [1, 1]} : vector<16x4xf32> to vector<16x1xf32>
    %10 = vector.extract_strided_slice %5 {offsets = [0, 1], sizes = [16, 1], strides = [1, 1]} : vector<16x4xf32> to vector<16x1xf32>
    %11 = vector.extract_strided_slice %5 {offsets = [0, 2], sizes = [16, 1], strides = [1, 1]} : vector<16x4xf32> to vector<16x1xf32>
    %12 = vector.extract_strided_slice %5 {offsets = [0, 3], sizes = [2, 1], strides = [1, 1]} : vector<16x4xf32> to vector<2x1xf32>
    %13 = tpu.iota {dimensions = array<i32: 1>} : vector<1x256xi32>
    %c128_i32 = arith.constant 128 : i32
    %c0_i32 = arith.constant 0 : i32
    %14 = arith.cmpi eq, %c128_i32, %c0_i32 : i32
    %c1_i32 = arith.constant 1 : i32
    %15 = arith.select %14, %c1_i32, %c128_i32 : i32
    %16 = vector.broadcast %15 : i32 to vector<1x256xi32>
    %17 = arith.remsi %13, %16 : vector<1x256xi32>
    %c0_i32_11 = arith.constant 0 : i32
    %18 = vector.broadcast %c0_i32_11 : i32 to vector<1x256xi32>
    %19 = arith.cmpi ne, %17, %18 : vector<1x256xi32>
    %c0_i32_12 = arith.constant 0 : i32
    %20 = vector.broadcast %c0_i32_12 : i32 to vector<1x256xi32>
    %21 = arith.cmpi slt, %17, %20 : vector<1x256xi32>
    %c0_i32_13 = arith.constant 0 : i32
    %22 = arith.cmpi slt, %15, %c0_i32_13 : i32
    %23 = vector.broadcast %22 : i1 to vector<1x256xi1>
    %24 = vector.broadcast %23 : vector<1x256xi1> to vector<1x256xi1>
    %25 = arith.xori %21, %24 : vector<1x256xi1>
    %26 = arith.andi %25, %19 : vector<1x256xi1>
    %27 = vector.broadcast %15 : i32 to vector<1x256xi32>
    %28 = arith.addi %17, %27 : vector<1x256xi32>
    %29 = arith.select %26, %28, %17 : vector<1x256xi1>, vector<1x256xi32>
    %c255_i32 = arith.constant 255 : i32
    %30 = tpu.dynamic_rotate %0 by %c255_i32 dim 1 : vector<32x256xf32>, i32 -> vector<32x256xf32>
    %c254_i32 = arith.constant 254 : i32
    %31 = tpu.dynamic_rotate %0 by %c254_i32 dim 1 : vector<32x256xf32>, i32 -> vector<32x256xf32>
    %c253_i32 = arith.constant 253 : i32
    %32 = tpu.dynamic_rotate %0 by %c253_i32 dim 1 : vector<32x256xf32>, i32 -> vector<32x256xf32>
    %c252_i32 = arith.constant 252 : i32
    %33 = tpu.dynamic_rotate %0 by %c252_i32 dim 1 : vector<32x256xf32>, i32 -> vector<32x256xf32>
    %c251_i32 = arith.constant 251 : i32
    %34 = tpu.dynamic_rotate %0 by %c251_i32 dim 1 : vector<32x256xf32>, i32 -> vector<32x256xf32>
    %c250_i32 = arith.constant 250 : i32
    %35 = tpu.dynamic_rotate %0 by %c250_i32 dim 1 : vector<32x256xf32>, i32 -> vector<32x256xf32>
    %36 = tpu.concatenate %0, %30, %31, %32, %33, %34, %35 in 0 : vector<32x256xf32>, vector<32x256xf32>, vector<32x256xf32>, vector<32x256xf32>, vector<32x256xf32>, vector<32x256xf32>, vector<32x256xf32> -> vector<224x256xf32>
    %cst = arith.constant dense<0.000000e+00> : vector<32x256xf32>
    %37 = tpu.matmul %1, %36, %cst {dimension_numbers = #tpu.dot_dimension_numbers<[1], [0], [0], [1], [0, 0, 1, 1], [], []>} : vector<32x224xf32>, vector<224x256xf32>, vector<32x256xf32> -> vector<32x256xf32>
    %38 = vector.broadcast %6 : vector<32x1xf32> to vector<32x256xf32>
    %39 = arith.addf %37, %38 : vector<32x256xf32>
    %cst_14 = arith.constant 0.000000e+00 : f32
    %40 = vector.broadcast %cst_14 : f32 to vector<32x256xf32>
    %41 = arith.maximumf %39, %40 : vector<32x256xf32>
    %c58_i32 = arith.constant 58 : i32
    %42 = vector.broadcast %c58_i32 : i32 to vector<1x256xi32>
    %43 = arith.cmpi slt, %29, %42 : vector<1x256xi32>
    %cst_15 = arith.constant 0.000000e+00 : f32
    %44 = vector.shape_cast %43 : vector<1x256xi1> to vector<1x256xi1>
    %45 = vector.broadcast %44 : vector<1x256xi1> to vector<32x256xi1>
    %46 = vector.broadcast %cst_15 : f32 to vector<32x256xf32>
    %47 = arith.select %45, %41, %46 : vector<32x256xi1>, vector<32x256xf32>
    %cst_16 = arith.constant dense<0.000000e+00> : vector<32xf32>
    %48 = vector.multi_reduction <add>, %47, %cst_16 [1] : vector<32x256xf32> to vector<32xf32>
    %49 = vector.shape_cast %48 : vector<32xf32> to vector<32x1xf32>
    %cst_17 = arith.constant 8.620690e-03 : f32
    %50 = vector.broadcast %cst_17 : f32 to vector<32x1xf32>
    %51 = arith.mulf %49, %50 : vector<32x1xf32>
    %52 = vector.broadcast %51 : vector<32x1xf32> to vector<32x256xf32>
    %53 = arith.subf %47, %52 : vector<32x256xf32>
    %cst_18 = arith.constant 0.000000e+00 : f32
    %54 = vector.shape_cast %43 : vector<1x256xi1> to vector<1x256xi1>
    %55 = vector.broadcast %54 : vector<1x256xi1> to vector<32x256xi1>
    %56 = vector.broadcast %cst_18 : f32 to vector<32x256xf32>
    %57 = arith.select %55, %53, %56 : vector<32x256xi1>, vector<32x256xf32>
    %58 = arith.mulf %57, %57 : vector<32x256xf32>
    %cst_19 = arith.constant dense<0.000000e+00> : vector<32xf32>
    %59 = vector.multi_reduction <add>, %58, %cst_19 [1] : vector<32x256xf32> to vector<32xf32>
    %60 = vector.shape_cast %59 : vector<32xf32> to vector<32x1xf32>
    %cst_20 = arith.constant 8.620690e-03 : f32
    %61 = vector.broadcast %cst_20 : f32 to vector<32x1xf32>
    %62 = arith.mulf %60, %61 : vector<32x1xf32>
    %cst_21 = arith.constant 9.99999974E-6 : f32
    %63 = vector.broadcast %cst_21 : f32 to vector<32x1xf32>
    %64 = arith.addf %62, %63 : vector<32x1xf32>
    %65 = math.rsqrt %64 : vector<32x1xf32>
    %66 = arith.mulf %7, %65 : vector<32x1xf32>
    %67 = arith.mulf %51, %66 : vector<32x1xf32>
    %68 = arith.subf %8, %67 : vector<32x1xf32>
    %69 = vector.broadcast %66 : vector<32x1xf32> to vector<32x256xf32>
    %70 = arith.mulf %47, %69 : vector<32x256xf32>
    %71 = vector.broadcast %68 : vector<32x1xf32> to vector<32x256xf32>
    %72 = arith.addf %70, %71 : vector<32x256xf32>
    %c255_i32_22 = arith.constant 255 : i32
    %73 = tpu.dynamic_rotate %72 by %c255_i32_22 dim 1 : vector<32x256xf32>, i32 -> vector<32x256xf32>
    %c254_i32_23 = arith.constant 254 : i32
    %74 = tpu.dynamic_rotate %72 by %c254_i32_23 dim 1 : vector<32x256xf32>, i32 -> vector<32x256xf32>
    %c253_i32_24 = arith.constant 253 : i32
    %75 = tpu.dynamic_rotate %72 by %c253_i32_24 dim 1 : vector<32x256xf32>, i32 -> vector<32x256xf32>
    %c252_i32_25 = arith.constant 252 : i32
    %76 = tpu.dynamic_rotate %72 by %c252_i32_25 dim 1 : vector<32x256xf32>, i32 -> vector<32x256xf32>
    %c251_i32_26 = arith.constant 251 : i32
    %77 = tpu.dynamic_rotate %72 by %c251_i32_26 dim 1 : vector<32x256xf32>, i32 -> vector<32x256xf32>
    %c250_i32_27 = arith.constant 250 : i32
    %78 = tpu.dynamic_rotate %72 by %c250_i32_27 dim 1 : vector<32x256xf32>, i32 -> vector<32x256xf32>
    %79 = tpu.concatenate %72, %73, %74, %75, %76, %77, %78 in 0 : vector<32x256xf32>, vector<32x256xf32>, vector<32x256xf32>, vector<32x256xf32>, vector<32x256xf32>, vector<32x256xf32>, vector<32x256xf32> -> vector<224x256xf32>
    %cst_28 = arith.constant dense<0.000000e+00> : vector<16x256xf32>
    %80 = tpu.matmul %2, %79, %cst_28 {dimension_numbers = #tpu.dot_dimension_numbers<[1], [0], [0], [1], [0, 0, 1, 1], [], []>} : vector<16x224xf32>, vector<224x256xf32>, vector<16x256xf32> -> vector<16x256xf32>
    %81 = vector.broadcast %9 : vector<16x1xf32> to vector<16x256xf32>
    %82 = arith.addf %80, %81 : vector<16x256xf32>
    %cst_29 = arith.constant 0.000000e+00 : f32
    %83 = vector.broadcast %cst_29 : f32 to vector<16x256xf32>
    %84 = arith.maximumf %82, %83 : vector<16x256xf32>
    %c52_i32 = arith.constant 52 : i32
    %85 = vector.broadcast %c52_i32 : i32 to vector<1x256xi32>
    %86 = arith.cmpi slt, %29, %85 : vector<1x256xi32>
    %cst_30 = arith.constant 0.000000e+00 : f32
    %87 = vector.shape_cast %86 : vector<1x256xi1> to vector<1x256xi1>
    %88 = vector.broadcast %87 : vector<1x256xi1> to vector<16x256xi1>
    %89 = vector.broadcast %cst_30 : f32 to vector<16x256xf32>
    %90 = arith.select %88, %84, %89 : vector<16x256xi1>, vector<16x256xf32>
    %cst_31 = arith.constant dense<0.000000e+00> : vector<16xf32>
    %91 = vector.multi_reduction <add>, %90, %cst_31 [1] : vector<16x256xf32> to vector<16xf32>
    %92 = vector.shape_cast %91 : vector<16xf32> to vector<16x1xf32>
    %cst_32 = arith.constant 0.00961538497 : f32
    %93 = vector.broadcast %cst_32 : f32 to vector<16x1xf32>
    %94 = arith.mulf %92, %93 : vector<16x1xf32>
    %95 = vector.broadcast %94 : vector<16x1xf32> to vector<16x256xf32>
    %96 = arith.subf %90, %95 : vector<16x256xf32>
    %cst_33 = arith.constant 0.000000e+00 : f32
    %97 = vector.shape_cast %86 : vector<1x256xi1> to vector<1x256xi1>
    %98 = vector.broadcast %97 : vector<1x256xi1> to vector<16x256xi1>
    %99 = vector.broadcast %cst_33 : f32 to vector<16x256xf32>
    %100 = arith.select %98, %96, %99 : vector<16x256xi1>, vector<16x256xf32>
    %101 = arith.mulf %100, %100 : vector<16x256xf32>
    %cst_34 = arith.constant dense<0.000000e+00> : vector<16xf32>
    %102 = vector.multi_reduction <add>, %101, %cst_34 [1] : vector<16x256xf32> to vector<16xf32>
    %103 = vector.shape_cast %102 : vector<16xf32> to vector<16x1xf32>
    %cst_35 = arith.constant 0.00961538497 : f32
    %104 = vector.broadcast %cst_35 : f32 to vector<16x1xf32>
    %105 = arith.mulf %103, %104 : vector<16x1xf32>
    %cst_36 = arith.constant 9.99999974E-6 : f32
    %106 = vector.broadcast %cst_36 : f32 to vector<16x1xf32>
    %107 = arith.addf %105, %106 : vector<16x1xf32>
    %108 = math.rsqrt %107 : vector<16x1xf32>
    %109 = arith.mulf %10, %108 : vector<16x1xf32>
    %110 = arith.mulf %94, %109 : vector<16x1xf32>
    %111 = arith.subf %11, %110 : vector<16x1xf32>
    %112 = vector.extract_strided_slice %90 {offsets = [0, 0], sizes = [16, 128], strides = [1, 1]} : vector<16x256xf32> to vector<16x128xf32>
    %cst_37 = arith.constant dense<0.000000e+00> : vector<16xf32>
    %113 = vector.multi_reduction <add>, %112, %cst_37 [1] : vector<16x128xf32> to vector<16xf32>
    %114 = vector.shape_cast %113 : vector<16xf32> to vector<16x1xf32>
    %115 = vector.extract_strided_slice %90 {offsets = [0, 128], sizes = [16, 128], strides = [1, 1]} : vector<16x256xf32> to vector<16x128xf32>
    %cst_38 = arith.constant dense<0.000000e+00> : vector<16xf32>
    %116 = vector.multi_reduction <add>, %115, %cst_38 [1] : vector<16x128xf32> to vector<16xf32>
    %117 = vector.shape_cast %116 : vector<16xf32> to vector<16x1xf32>
    %118 = tpu.concatenate %114, %117 in 1 : vector<16x1xf32>, vector<16x1xf32> -> vector<16x2xf32>
    %cst_39 = arith.constant 0.0192307699 : f32
    %119 = vector.broadcast %cst_39 : f32 to vector<16x2xf32>
    %120 = arith.mulf %118, %119 : vector<16x2xf32>
    %121 = vector.broadcast %109 : vector<16x1xf32> to vector<16x2xf32>
    %122 = arith.mulf %120, %121 : vector<16x2xf32>
    %123 = vector.broadcast %111 : vector<16x1xf32> to vector<16x2xf32>
    %124 = arith.addf %122, %123 : vector<16x2xf32>
    %cst_40 = arith.constant dense<0.000000e+00> : vector<2x2xf32>
    %125 = tpu.matmul %3, %124, %cst_40 {dimension_numbers = #tpu.dot_dimension_numbers<[1], [0], [0], [1], [0, 0, 1, 1], [], []>} : vector<2x16xf32>, vector<16x2xf32>, vector<2x2xf32> -> vector<2x2xf32>
    %126 = vector.broadcast %12 : vector<2x1xf32> to vector<2x2xf32>
    %127 = arith.addf %125, %126 : vector<2x2xf32>
    %c0_41 = arith.constant 0 : index
    %c0_42 = arith.constant 0 : index
    %128 = vector.load %arg6[%c0_41, %c0_42] : memref<2x2xf32, #tpu.memory_space<vmem>>, vector<2x2xf32>
    tpu.vector_store %arg6[%c0_41, %c0_42], %127 {strides = array<i32>} : memref<2x2xf32, #tpu.memory_space<vmem>>, vector<2x2xf32>,
    return
  }
}

</mosaic_0001>

<bundles_post_ra>
// kernel: tpu_custom_call.1
= control target key start
LH: loop header
LB: loop body
LE: loop exit
PB: predicated region body
PF: predicated region fallthrough
CT: control target
= control target key end

     0   :  { %11 = vsyncpa [#allocation3], 0  ;;  %s1824_s0 = inlined_call_operand.hbm [shape: f32[32,256], index: 0, kind: input, shape index: {}]   ;;  %s1825_s1 = inlined_call_operand.hbm [shape: f32[32,224], index: 1, kind: input, shape index: {}]   ;;  %s1826_s2 = inlined_call_operand.vmem [shape: f32[16,224], index: 2, kind: input, shape index: {}]   ;;  %s1827_s3 = inlined_call_operand.vmem [shape: f32[2,16], index: 3, kind: input, shape index: {}]   ;;  %s1828_s4 = inlined_call_operand.vmem [shape: f32[32,3], index: 4, kind: input, shape index: {}]   ;;  %s1829_s5 = inlined_call_operand.vmem [shape: f32[16,4], index: 5, kind: input, shape index: {}]   ;;  %s1830_s6 = inlined_call_operand.hbm [shape: f32[2,2], index: 6, kind: output, shape index: {}]  }
   0x1   :  { %12 = vsyncpa [#allocation6], 0 }
   0x2   :  { %13 = vsyncpa [#allocation4], 0  ;;  %s1104_s21 = smov [#allocation2]  }
   0x3   :  { %s19_s22 = sshll.u32 %s1104_s21, 4  ;;  %s20_s22 = int_to_ptr.vmem [resolvable:$true] %s19_s22 }
   0x4   :  { %s1046_s23 = scalar_lea.vmem %s20_s22, 1024  ;;  %p1051_p1 = scmp.lt.s32.totalorder %s20_s22, %s20_s22 }
   0x5   :  { %p1047_p0 = scmp.ne.s32.totalorder %s20_s22, %s1046_s23  ;;  %p1052_p2 = scmp.lt.s32.totalorder %s1046_s23, %s1046_s23 }
   0x7   :  { %p1053_p3 = por %p1052_p2, %p1051_p1 }
   0x9   :  { %p1054_p4 = pnand %p1053_p3, %p1047_p0 }
   0xb   :  { %1057 = shalt.err (!%p1054_p4)
}
   0xc   :  { %s1105_s24 = smov 256   ;;  %s1106_s25 = smov 16  }
   0xd   :  { %25 = dma.hbm_to_vmem [thread:$0]  %s1824_s0, 1024, %s20_s22, [#allocation3], %s1105_s24, %s1105_s24, %s1106_s25  }
   0xe   :  { %s1107_s28 = smov [#allocation5]  }
   0xf   :  { %s31_s29 = sshll.u32 %s1107_s28, 4  ;;  %s32_s29 = int_to_ptr.vmem [resolvable:$true] %s31_s29 }
  0x10   :  { %s1066_s30 = scalar_lea.vmem %s32_s29, 1024  ;;  %p1071_p6 = scmp.lt.s32.totalorder %s32_s29, %s32_s29 }
  0x11   :  { %p1067_p5 = scmp.ne.s32.totalorder %s32_s29, %s1066_s30  ;;  %p1072_p7 = scmp.lt.s32.totalorder %s1066_s30, %s1066_s30 }
  0x13   :  { %p1073_p8 = por %p1072_p7, %p1071_p6 }
  0x15   :  { %p1074_p9 = pnand %p1073_p8, %p1067_p5 }
  0x17   :  { %1077 = shalt.err (!%p1074_p9)
}
  0x18   :  { %37 = dma.hbm_to_vmem [thread:$0]  %s1825_s1, 1024, %s32_s29, [#allocation6], %s1105_s24, %s1105_s24, %s1106_s25  }
  0x19   :  { %1098 = dma.done.wait [#allocation3], 1024  }
  0x1a   :  { %1099 = vsyncadd [#allocation3], 4294966272 }
  0x1b   :  { %1100 = dma.done.wait [#allocation6], 1024  }
  0x1c   :  { %1101 = vsyncadd [#allocation6], 4294966272  ;;  %v1163_v0 = vld [vmem:[#allocation2 + $0x30] sm:$0xff]  ;;  %v1165_v1 = vld [vmem:[#allocation2 + $0x20] sm:$0xff]  ;;  %s1108_s0 = smov 125   ;;  %s1109_s1 = smov 126   ;;  %v79_v14 = vlaneseq }
  0x1d   :  { %162 = vrot.lane.b32.xlu0 %v1163_v0, %s1108_s0  ;;  %160 = vrot.lane.b32.xlu1 %v1165_v1, %s1108_s0  ;;  %v1171_v2 = vld [vmem:[#allocation2 + $0x38] sm:$0xff]  ;;  %v1173_v3 = vld [vmem:[#allocation2 + $0x28] sm:$0xff]  ;;  %v1181_v5 = vld [vmem:[#allocation2 + $0x10] sm:$0xff]  ;;  %s1110_s9 = smov 127   ;;  %s1111_s10 = smov 122   ;;  %vm276_vm0 = vcmask 785408  }
  0x1e   :  { %v1179_v4 = vld [vmem:[#allocation2 + $0x18] sm:$0xff]  ;;  %v1187_v6 = vld [vmem:[#allocation2 + $0x8] sm:$0xff]  ;;  %v1189_v7 = vld [vmem:[#allocation2] sm:$0xff]  ;;  %s1112_s11 = smov 123   ;;  %s1113_s12 = smov 124   ;;  %v1114_v11 = vmov 0  }
  0x1f   :  { %v61_v8 = vld [vmem:[#allocation5 + $0x8] sm:$0xff]  ;;  %v1279_v9 = vld [vmem:[%s1828_s4 + $0x18] sm:$0xff]  ;;  %v1284_v10 = vld [vmem:[%s1828_s4 + $0x10] sm:$0xff]  ;;  %1013 = vset.pattern.permute.xlu0 %v1114_v11  ;;  %1014 = vset.pattern.permute.xlu1 %v1114_v11  ;;  %v1302_v15 = vand.u32 127, %v79_v14  ;;  %vm1119_vm11 = vmmov 0   ;;  %vm853_vm12 = vcmask 7168  }
  0x20   :  { %978 = vmatprep.mubr.msk.f32.mxu0 %vm276_vm0, %v61_v8  ;;  %v1293_v12 = vld [vmem:[%s1828_s4] sm:$0xff]  ;;  %v1298_v13 = vld [vmem:[%s1828_s4 + $0x8] sm:$0xff]  ;;  %s1116_s4 = smov 1   ;;  %vm886_vm13 = vcmask 130048   ;;  %vm960_vm14 = vcmask 9216  }
  0x21   :  { %170 = vrot.lane.b32.xlu0 %v1171_v2, %s1108_s0  ;;  %168 = vrot.lane.b32.xlu1 %v1173_v3, %s1108_s0  ;;  %vm172_vm1 = vcmp.lt.s32.totalorder %v1302_v15, 125  ;;  %vm147_vm2 = vcmp.lt.s32.totalorder %v1302_v15, 126  ;;  %vm122_vm3 = vcmp.lt.s32.totalorder %v1302_v15, 127  ;;  %vm247_vm4 = vcmp.lt.s32.totalorder %v1302_v15, 122 }
  0x22   :  { %vm222_vm5 = vcmp.lt.s32.totalorder %v1302_v15, 123  ;;  %vm197_vm6 = vcmp.lt.s32.totalorder %v1302_v15, 124  ;;  %vm386_vm8 = vcmp.lt.s32.totalorder %v1302_v15, 58  ;;  %vm789_vm9 = vcmp.lt.s32.totalorder %v1302_v15, 52 }
  0x25   :  { %166 = vrot.lane.b32.xlu1 %v1179_v4, %s1108_s0  ;;  %158 = vrot.lane.b32.xlu0 %v1181_v5, %s1108_s0 }
  0x29   :  { %164 = vrot.lane.b32.xlu1 %v1187_v6, %s1108_s0  ;;  %156 = vrot.lane.b32.xlu0 %v1189_v7, %s1108_s0 }
  0x2d   :  { %145 = vrot.lane.b32.xlu1 %v1171_v2, %s1109_s1  ;;  %137 = vrot.lane.b32.xlu0 %v1163_v0, %s1109_s1 }
  0x31   :  { %143 = vrot.lane.b32.xlu1 %v1173_v3, %s1109_s1  ;;  %135 = vrot.lane.b32.xlu0 %v1165_v1, %s1109_s1 }
  0x35   :  { %141 = vrot.lane.b32.xlu1 %v1179_v4, %s1109_s1  ;;  %133 = vrot.lane.b32.xlu0 %v1181_v5, %s1109_s1 }
  0x39   :  { %139 = vrot.lane.b32.xlu1 %v1187_v6, %s1109_s1  ;;  %131 = vrot.lane.b32.xlu0 %v1189_v7, %s1109_s1 }
  0x3d   :  { %120 = vrot.lane.b32.xlu1 %v1171_v2, %s1110_s9  ;;  %112 = vrot.lane.b32.xlu0 %v1163_v0, %s1110_s9 }
  0x41   :  { %118 = vrot.lane.b32.xlu1 %v1173_v3, %s1110_s9  ;;  %110 = vrot.lane.b32.xlu0 %v1165_v1, %s1110_s9 }
  0x45   :  { %116 = vrot.lane.b32.xlu1 %v1179_v4, %s1110_s9  ;;  %108 = vrot.lane.b32.xlu0 %v1181_v5, %s1110_s9 }
  0x49   :  { %114 = vrot.lane.b32.xlu1 %v1187_v6, %s1110_s9  ;;  %106 = vrot.lane.b32.xlu0 %v1189_v7, %s1110_s9 }
  0x4d   :  { %245 = vrot.lane.b32.xlu1 %v1171_v2, %s1111_s10  ;;  %237 = vrot.lane.b32.xlu0 %v1163_v0, %s1111_s10 }
  0x51   :  { %243 = vrot.lane.b32.xlu1 %v1173_v3, %s1111_s10  ;;  %235 = vrot.lane.b32.xlu0 %v1165_v1, %s1111_s10 }
  0x55   :  { %241 = vrot.lane.b32.xlu1 %v1179_v4, %s1111_s10  ;;  %233 = vrot.lane.b32.xlu0 %v1181_v5, %s1111_s10 }
  0x59   :  { %239 = vrot.lane.b32.xlu1 %v1187_v6, %s1111_s10  ;;  %231 = vrot.lane.b32.xlu0 %v1189_v7, %s1111_s10 }
  0x5d   :  { %220 = vrot.lane.b32.xlu1 %v1171_v2, %s1112_s11  ;;  %212 = vrot.lane.b32.xlu0 %v1163_v0, %s1112_s11 }
  0x61   :  { %218 = vrot.lane.b32.xlu1 %v1173_v3, %s1112_s11  ;;  %210 = vrot.lane.b32.xlu0 %v1165_v1, %s1112_s11 }
  0x65   :  { %216 = vrot.lane.b32.xlu1 %v1179_v4, %s1112_s11  ;;  %208 = vrot.lane.b32.xlu0 %v1181_v5, %s1112_s11 }
  0x69   :  { %214 = vrot.lane.b32.xlu1 %v1187_v6, %s1112_s11  ;;  %206 = vrot.lane.b32.xlu0 %v1189_v7, %s1112_s11 }
  0x6d   :  { %195 = vrot.lane.b32.xlu1 %v1171_v2, %s1113_s12  ;;  %187 = vrot.lane.b32.xlu0 %v1163_v0, %s1113_s12 }
  0x71   :  { %193 = vrot.lane.b32.xlu1 %v1173_v3, %s1113_s12  ;;  %185 = vrot.lane.b32.xlu0 %v1165_v1, %s1113_s12 }
  0x75   :  { %191 = vrot.lane.b32.xlu1 %v1179_v4, %s1113_s12  ;;  %183 = vrot.lane.b32.xlu0 %v1181_v5, %s1113_s12 }
  0x79   :  { %189 = vrot.lane.b32.xlu1 %v1187_v6, %s1113_s12  ;;  %181 = vrot.lane.b32.xlu0 %v1189_v7, %s1113_s12 }
  0x7d   :  { %273 = vperm.xlu0 %1013, %v1279_v9   ;;  %268 = vperm.xlu1 %1014, %v1284_v10  }
  0x81   :  { %258 = vperm.xlu0 %1013, %v1293_v12   ;;  %263 = vperm.xlu1 %1014, %v1298_v13  }
  0x8f   :  { %v163_v16 = vpop.permute.xlu0 %162  ;;  %v161_v17 = vpop.permute.xlu1 %160 }
  0x93   :  { %v171_v18 = vpop.permute.xlu0 %170  ;;  %v169_v19 = vpop.permute.xlu1 %168 }
  0x94   :  { %v180_v20 = vsel %vm172_vm1, %v171_v18, %v163_v16  ;;  %v176_v21 = vsel %vm172_vm1, %v163_v16, %v171_v18  ;;  %v179_v22 = vsel %vm172_vm1, %v169_v19, %v161_v17  ;;  %v175_v25 = vsel %vm172_vm1, %v161_v17, %v169_v19 }
  0x95   :  { %289 = vmatprep.subr.mxu0 %v180_v20 }
  0x96   :  { %290 = vmatpush1.msra.mxu0 %v176_v21 }
  0x97   :  { %291 = vmatprep.subr.mxu0 %v179_v22  ;;  %v167_v23 = vpop.permute.xlu1 %166  ;;  %v159_v24 = vpop.permute.xlu0 %158 }
  0x98   :  { %292 = vmatpush1.msra.mxu0 %v175_v25  ;;  %v178_v26 = vsel %vm172_vm1, %v167_v23, %v159_v24  ;;  %v174_v27 = vsel %vm172_vm1, %v159_v24, %v167_v23 }
  0x99   :  { %293 = vmatprep.subr.mxu0 %v178_v26 }
  0x9a   :  { %294 = vmatpush1.msra.mxu0 %v174_v27 }
  0x9b   :  { %v165_v28 = vpop.permute.xlu1 %164  ;;  %v157_v29 = vpop.permute.xlu0 %156 }
  0x9c   :  { %v177_v30 = vsel %vm172_vm1, %v165_v28, %v157_v29  ;;  %v173_v31 = vsel %vm172_vm1, %v157_v29, %v165_v28 }
  0x9d   :  { %295 = vmatprep.subr.mxu0 %v177_v30 }
  0x9e   :  { %296 = vmatpush1.msra.mxu0 %v173_v31 }
  0x9f   :  { %v146_v32 = vpop.permute.xlu1 %145  ;;  %v138_v33 = vpop.permute.xlu0 %137 }
  0xa0   :  { %v155_v34 = vsel %vm147_vm2, %v146_v32, %v138_v33  ;;  %v151_v35 = vsel %vm147_vm2, %v138_v33, %v146_v32 }
  0xa1   :  { %297 = vmatprep.subr.mxu0 %v155_v34 }
  0xa2   :  { %298 = vmatpush1.msra.mxu0 %v151_v35 }
  0xa3   :  { %v144_v36 = vpop.permute.xlu1 %143  ;;  %v136_v37 = vpop.permute.xlu0 %135 }
  0xa4   :  { %v154_v38 = vsel %vm147_vm2, %v144_v36, %v136_v37  ;;  %v150_v39 = vsel %vm147_vm2, %v136_v37, %v144_v36 }
  0xa5   :  { %299 = vmatprep.subr.mxu0 %v154_v38 }
  0xa6   :  { %300 = vmatpush1.msra.mxu0 %v150_v39 }
  0xa7   :  { %v142_v40 = vpop.permute.xlu1 %141  ;;  %v134_v41 = vpop.permute.xlu0 %133 }
  0xa8   :  { %v153_v42 = vsel %vm147_vm2, %v142_v40, %v134_v41  ;;  %v149_v43 = vsel %vm147_vm2, %v134_v41, %v142_v40 }
  0xa9   :  { %301 = vmatprep.subr.mxu0 %v153_v42 }
  0xaa   :  { %302 = vmatpush1.msra.mxu0 %v149_v43 }
  0xab   :  { %v140_v44 = vpop.permute.xlu1 %139  ;;  %v132_v45 = vpop.permute.xlu0 %131 }
  0xac   :  { %v152_v46 = vsel %vm147_vm2, %v140_v44, %v132_v45  ;;  %v148_v47 = vsel %vm147_vm2, %v132_v45, %v140_v44 }
  0xad   :  { %303 = vmatprep.subr.mxu0 %v152_v46 }
  0xae   :  { %304 = vmatpush1.msra.mxu0 %v148_v47 }
  0xaf   :  { %v121_v48 = vpop.permute.xlu1 %120  ;;  %v113_v49 = vpop.permute.xlu0 %112 }
  0xb0   :  { %v130_v50 = vsel %vm122_vm3, %v121_v48, %v113_v49  ;;  %v126_v51 = vsel %vm122_vm3, %v113_v49, %v121_v48 }
  0xb1   :  { %305 = vmatprep.subr.mxu0 %v130_v50 }
  0xb2   :  { %306 = vmatpush1.msra.mxu0 %v126_v51 }
  0xb3   :  { %v119_v52 = vpop.permute.xlu1 %118  ;;  %v111_v53 = vpop.permute.xlu0 %110 }
  0xb4   :  { %v129_v54 = vsel %vm122_vm3, %v119_v52, %v111_v53  ;;  %v125_v55 = vsel %vm122_vm3, %v111_v53, %v119_v52 }
  0xb5   :  { %307 = vmatprep.subr.mxu0 %v129_v54  ;;  %v60_v54 = vld [vmem:[#allocation5] sm:$0xff] }
  0xb6   :  { %308 = vmatpush1.msra.mxu0 %v125_v55  ;;  %v63_v55 = vld [vmem:[#allocation5 + $0x18] sm:$0xff] }
  0xb7   :  { %v117_v56 = vpop.permute.xlu1 %116  ;;  %v109_v57 = vpop.permute.xlu0 %108 }
  0xb8   :  { %v128_v58 = vsel %vm122_vm3, %v117_v56, %v109_v57  ;;  %v124_v59 = vsel %vm122_vm3, %v109_v57, %v117_v56  ;;  %v62_v56 = vld [vmem:[#allocation5 + $0x10] sm:$0xff]  ;;  %v65_v57 = vld [vmem:[#allocation5 + $0x28] sm:$0xff] }
  0xb9   :  { %309 = vmatprep.subr.mxu0 %v128_v58  ;;  %v64_v58 = vld [vmem:[#allocation5 + $0x20] sm:$0xff] }
  0xba   :  { %310 = vmatpush1.msra.mxu0 %v124_v59  ;;  %v67_v59 = vld [vmem:[#allocation5 + $0x38] sm:$0xff] }
  0xbb   :  { %v115_v60 = vpop.permute.xlu1 %114  ;;  %v107_v61 = vpop.permute.xlu0 %106 }
  0xbc   :  { %v127_v62 = vsel %vm122_vm3, %v115_v60, %v107_v61  ;;  %v123_v63 = vsel %vm122_vm3, %v107_v61, %v115_v60  ;;  %v66_v60 = vld [vmem:[#allocation5 + $0x30] sm:$0xff] }
  0xbd   :  { %311 = vmatprep.subr.mxu0 %v127_v62 }
  0xbe   :  { %312 = vmatpush1.msra.mxu0 %v123_v63 }
  0xbf   :  { %v246_v8 = vpop.permute.xlu1 %245  ;;  %313 = vmatprep.subr.mxu0 %v1171_v2  ;;  %v238_v14 = vpop.permute.xlu0 %237 }
  0xc0   :  { %314 = vmatpush1.msra.mxu0 %v1163_v0  ;;  %v255_v2 = vsel %vm247_vm4, %v246_v8, %v238_v14 }
  0xc1   :  { %315 = vmatprep.subr.mxu0 %v1173_v3 }
  0xc2   :  { %316 = vmatpush1.msra.mxu0 %v1165_v1  ;;  %v251_v1 = vsel %vm247_vm4, %v238_v14, %v246_v8 }
  0xc3   :  { %v244_v16 = vpop.permute.xlu1 %243  ;;  %317 = vmatprep.subr.mxu0 %v1179_v4  ;;  %v236_v17 = vpop.permute.xlu0 %235 }
  0xc4   :  { %318 = vmatpush1.msra.mxu0 %v1181_v5  ;;  %v254_v4 = vsel %vm247_vm4, %v244_v16, %v236_v17  ;;  %v250_v5 = vsel %vm247_vm4, %v236_v17, %v244_v16  ;;  %v1418_v16 = vadd.s32 128, %v1302_v15 }
  0xc5   :  { %319 = vmatprep.subr.mxu0 %v1187_v6 }
  0xc6   :  { %320 = vmatpush1.msra.mxu0 %v1189_v7 }
  0xc7   :  { %v242_v0 = vpop.permute.xlu1 %241  ;;  %329 = vmatprep.subr.mxu0 %v255_v2  ;;  %v234_v3 = vpop.permute.xlu0 %233 }
  0xc8   :  { %330 = vmatpush2.msra.mxu0 %v251_v1  ;;  %v253_v6 = vsel %vm247_vm4, %v242_v0, %v234_v3  ;;  %v249_v19 = vsel %vm247_vm4, %v234_v3, %v242_v0 }
  0xc9   :  { %331 = vmatprep.subr.mxu0 %v254_v4  ;;  %v93_v4 = vand.u32 127, %v1418_v16 }
  0xca   :  { %332 = vmatpush2.msra.mxu0 %v250_v5 }
  0xcb   :  { %v240_v7 = vpop.permute.xlu1 %239  ;;  %333 = vmatprep.subr.mxu0 %v253_v6  ;;  %v232_v18 = vpop.permute.xlu0 %231  ;;  %vm1423_vm7 = vcmp.lt.s32.totalorder %v93_v4, 58  ;;  %vm1790_vm10 = vcmp.lt.s32.totalorder %v93_v4, 52 }
  0xcc   :  { %334 = vmatpush2.msra.mxu0 %v249_v19  ;;  %v252_v20 = vsel %vm247_vm4, %v240_v7, %v232_v18  ;;  %v248_v21 = vsel %vm247_vm4, %v232_v18, %v240_v7 }
  0xcd   :  { %335 = vmatprep.subr.mxu0 %v252_v20 }
  0xce   :  { %336 = vmatpush2.msra.mxu0 %v248_v21 }
  0xcf   :  { %v221_v22 = vpop.permute.xlu1 %220  ;;  %v213_v23 = vpop.permute.xlu0 %212 }
  0xd0   :  { %v230_v24 = vsel %vm222_vm5, %v221_v22, %v213_v23  ;;  %v226_v25 = vsel %vm222_vm5, %v213_v23, %v221_v22 }
  0xd1   :  { %337 = vmatprep.subr.mxu0 %v230_v24 }
  0xd2   :  { %338 = vmatpush2.msra.mxu0 %v226_v25 }
  0xd3   :  { %v219_v26 = vpop.permute.xlu1 %218  ;;  %v211_v27 = vpop.permute.xlu0 %210 }
  0xd4   :  { %v229_v28 = vsel %vm222_vm5, %v219_v26, %v211_v27  ;;  %v225_v29 = vsel %vm222_vm5, %v211_v27, %v219_v26 }
  0xd5   :  { %339 = vmatprep.subr.mxu0 %v229_v28 }
  0xd6   :  { %340 = vmatpush2.msra.mxu0 %v225_v29 }
  0xd7   :  { %v217_v30 = vpop.permute.xlu1 %216  ;;  %v209_v31 = vpop.permute.xlu0 %208 }
  0xd8   :  { %v228_v32 = vsel %vm222_vm5, %v217_v30, %v209_v31  ;;  %v224_v33 = vsel %vm222_vm5, %v209_v31, %v217_v30 }
  0xd9   :  { %341 = vmatprep.subr.mxu0 %v228_v32 }
  0xda   :  { %342 = vmatpush2.msra.mxu0 %v224_v33 }
  0xdb   :  { %v215_v34 = vpop.permute.xlu1 %214  ;;  %v207_v35 = vpop.permute.xlu0 %206 }
  0xdc   :  { %v227_v36 = vsel %vm222_vm5, %v215_v34, %v207_v35  ;;  %v223_v37 = vsel %vm222_vm5, %v207_v35, %v215_v34 }
  0xdd   :  { %343 = vmatprep.subr.mxu0 %v227_v36 }
  0xde   :  { %344 = vmatpush2.msra.mxu0 %v223_v37 }
  0xdf   :  { %v196_v38 = vpop.permute.xlu1 %195  ;;  %v188_v39 = vpop.permute.xlu0 %187 }
  0xe0   :  { %v205_v40 = vsel %vm197_vm6, %v196_v38, %v188_v39  ;;  %v201_v41 = vsel %vm197_vm6, %v188_v39, %v196_v38 }
  0xe1   :  { %345 = vmatprep.subr.mxu0 %v205_v40 }
  0xe2   :  { %346 = vmatpush2.msra.mxu0 %v201_v41 }
  0xe3   :  { %v194_v42 = vpop.permute.xlu1 %193  ;;  %v186_v43 = vpop.permute.xlu0 %185 }
  0xe4   :  { %v204_v44 = vsel %vm197_vm6, %v194_v42, %v186_v43  ;;  %v200_v45 = vsel %vm197_vm6, %v186_v43, %v194_v42 }
  0xe5   :  { %347 = vmatprep.subr.mxu0 %v204_v44 }
  0xe6   :  { %348 = vmatpush2.msra.mxu0 %v200_v45 }
  0xe7   :  { %v192_v46 = vpop.permute.xlu1 %191  ;;  %v184_v47 = vpop.permute.xlu0 %183 }
  0xe8   :  { %v203_v48 = vsel %vm197_vm6, %v192_v46, %v184_v47  ;;  %v199_v49 = vsel %vm197_vm6, %v184_v47, %v192_v46 }
  0xe9   :  { %349 = vmatprep.subr.mxu0 %v203_v48 }
  0xea   :  { %350 = vmatpush2.msra.mxu0 %v199_v49 }
  0xeb   :  { %v190_v50 = vpop.permute.xlu1 %189  ;;  %v182_v51 = vpop.permute.xlu0 %181 }
  0xec   :  { %v202_v52 = vsel %vm197_vm6, %v190_v50, %v182_v51  ;;  %v198_v53 = vsel %vm197_vm6, %v182_v51, %v190_v50 }
  0xed   :  { %351 = vmatprep.subr.mxu0 %v202_v52 }
  0xee   :  { %352 = vmatpush2.msra.mxu0 %v198_v53 }
  0xef   :  { %354 = vmatmul.mubr.f32.vlgmr.msra.gmra.mxu0 %v60_v54 }
  0xf0   :  { %979 = vmatprep.mubr.msk.f32.mxu0 %vm276_vm0, %v63_v55 }
  0xf3   :  { %360 = vmatmul.mubr.f32.gmra.mxu0 %v62_v56 }
  0xf4   :  { %980 = vmatprep.mubr.msk.f32.mxu0 %vm276_vm0, %v65_v57 }
  0xf7   :  { %366 = vmatmul.mubr.f32.gmra.mxu0 %v64_v58 }
  0xf8   :  { %981 = vmatprep.mubr.msk.f32.mxu0 %vm276_vm0, %v67_v59  ;;  %v269_v62 = vpop.permute.xlu1 %268  ;;  %v274_v14 = vpop.permute.xlu0 %273 }
  0xfb   :  { %372 = vmatmul.mubr.f32.gmra.mxu0 %v66_v60 }
  0xfc   :  { %v264_v2 = vpop.permute.xlu1 %263  ;;  %v259_v7 = vpop.permute.xlu0 %258 }
 0x1af   :  { %v355_v61 = vpop.f32.mrf.mxu0 }
 0x1b0   :  { %v356_v25 = vadd.f32 %v355_v61, %v259_v7 }
 0x1b1   :  { %v357_v63 = vpop.f32.mrf.mxu0 }
 0x1b2   :  { %v358_v21 = vadd.f32 %v357_v63, %v259_v7  ;;  %v378_v37 = vmax.f32 %v356_v25, 0.0 }
 0x1b3   :  { %v361_v8 = vpop.f32.mrf.mxu0 }
 0x1b4   :  { %v362_v5 = vadd.f32 %v361_v8, %v264_v2  ;;  %v379_v34 = vmax.f32 %v358_v21, 0.0  ;;  %v1464_v44 = vsel %vm386_vm8, %v378_v37, 0.0 }
 0x1b5   :  { %v363_v17 = vpop.f32.mrf.mxu0 }
 0x1b6   :  { %v364_v3 = vadd.f32 %v363_v17, %v264_v2  ;;  %v380_v27 = vmax.f32 %v362_v5, 0.0  ;;  %v1460_v43 = vsel %vm1423_vm7, %v379_v34, 0.0 }
 0x1b7   :  { %v367_v0 = vpop.f32.mrf.mxu0  ;;  %v400_v45 = vadd.f32 %v1460_v43, %v1464_v44 }
 0x1b8   :  { %v368_v1 = vadd.f32 %v367_v0, %v269_v62  ;;  %v381_v22 = vmax.f32 %v364_v3, 0.0  ;;  %v1444_v38 = vsel %vm386_vm8, %v380_v27, 0.0  ;;  %v1115_v27 = vmov 1  }
 0x1b9   :  { %v369_v6 = vpop.f32.mrf.mxu0  ;;  %1015 = vset.pattern.permute.xlu1 %v1115_v27  ;;  %1016 = vset.pattern.permute.xlu0 %v1115_v27 }
 0x1ba   :  { %v382_v18 = vmax.f32 %v368_v1, 0.0  ;;  %v370_v19 = vadd.f32 %v369_v6, %v269_v62  ;;  %v1440_v35 = vsel %vm1423_vm7, %v381_v22, 0.0 }
 0x1bb   :  { %v373_v20 = vpop.f32.mrf.mxu0  ;;  %v403_v41 = vadd.f32 %v1440_v35, %v1444_v38 }
 0x1bc   :  { %v383_v23 = vmax.f32 %v370_v19, 0.0  ;;  %v374_v24 = vadd.f32 %v373_v20, %v274_v14  ;;  %v1430_v29 = vsel %vm386_vm8, %v382_v18, 0.0 }
 0x1bd   :  { %v375_v28 = vpop.f32.mrf.mxu0 }
 0x1be   :  { %v1434_v30 = vsel %vm1423_vm7, %v383_v23, 0.0  ;;  %v384_v31 = vmax.f32 %v374_v24, 0.0  ;;  %v376_v32 = vadd.f32 %v375_v28, %v274_v14 }
 0x1bf   :  { %v406_v33 = vadd.f32 %v1434_v30, %v1430_v29 }
 0x1c0   :  { %v385_v36 = vmax.f32 %v376_v32, 0.0  ;;  %v1448_v39 = vsel %vm386_vm8, %v384_v31, 0.0 }
 0x1c1   :  { %407 = vadd.xlane.f32.xlu0 %v406_v33 }
 0x1c2   :  { %v1452_v40 = vsel %vm1423_vm7, %v385_v36, 0.0 }
 0x1c3   :  { %v409_v42 = vadd.f32 %v1452_v40, %v1448_v39 }
 0x1c5   :  { %404 = vadd.xlane.f32.xlu0 %v403_v41  ;;  %410 = vadd.xlane.f32.xlu1 %v409_v42 }
 0x1c9   :  { %401 = vadd.xlane.f32.xlu1 %v400_v45 }
 0x24a   :  { %v408_v46 = vpop.xlane.xlu0 %407 }
 0x24b   :  { %v414_v47 = vmul.f32 0.00862069, %v408_v46 }
 0x24d   :  { %v420_v48 = vsub.f32 %v1430_v29, %v414_v47  ;;  %v421_v49 = vsub.f32 %v1434_v30, %v414_v47 }
 0x24e   :  { %v411_v50 = vpop.xlane.xlu1 %410  ;;  %v405_v51 = vpop.xlane.xlu0 %404 }
 0x24f   :  { %v415_v52 = vmul.f32 0.00862069, %v411_v50  ;;  %v1470_v53 = vmul.f32 0.00862069, %v405_v51  ;;  %v428_v54 = vsel %vm386_vm8, %v420_v48, 0.0  ;;  %v429_v55 = vsel %vm1423_vm7, %v421_v49, 0.0 }
 0x250   :  { %v436_v56 = vmul.f32 %v428_v54, %v428_v54  ;;  %v437_v57 = vmul.f32 %v429_v55, %v429_v55 }
 0x251   :  { %v422_v58 = vsub.f32 %v1448_v39, %v415_v52  ;;  %v423_v59 = vsub.f32 %v1452_v40, %v415_v52  ;;  %v418_v60 = vsub.f32 %v1444_v38, %v1470_v53  ;;  %v419_v61 = vsub.f32 %v1440_v35, %v1470_v53 }
 0x252   :  { %v402_v62 = vpop.xlane.xlu1 %401  ;;  %v446_v63 = vadd.f32 %v437_v57, %v436_v56 }
 0x253   :  { %v412_v8 = vmul.f32 0.00862069, %v402_v62  ;;  %v430_v14 = vsel %vm386_vm8, %v422_v58, 0.0  ;;  %v431_v17 = vsel %vm1423_vm7, %v423_v59, 0.0  ;;  %v426_v2 = vsel %vm386_vm8, %v418_v60, 0.0 }
 0x254   :  { %447 = vadd.xlane.f32.xlu1 %v446_v63  ;;  %v438_v0 = vmul.f32 %v430_v14, %v430_v14  ;;  %v439_v3 = vmul.f32 %v431_v17, %v431_v17  ;;  %v427_v1 = vsel %vm1423_vm7, %v419_v61, 0.0  ;;  %v434_v18 = vmul.f32 %v426_v2, %v426_v2 }
 0x255   :  { %v416_v5 = vsub.f32 %v1464_v44, %v412_v8  ;;  %v417_v6 = vsub.f32 %v1460_v43, %v412_v8  ;;  %v435_v19 = vmul.f32 %v427_v1, %v427_v1 }
 0x256   :  { %v449_v7 = vadd.f32 %v439_v3, %v438_v0 }
 0x257   :  { %v424_v20 = vsel %vm386_vm8, %v416_v5, 0.0  ;;  %v425_v21 = vsel %vm1423_vm7, %v417_v6, 0.0  ;;  %v443_v25 = vadd.f32 %v435_v19, %v434_v18 }
 0x258   :  { %450 = vadd.xlane.f32.xlu0 %v449_v7  ;;  %v432_v22 = vmul.f32 %v424_v20, %v424_v20  ;;  %v433_v23 = vmul.f32 %v425_v21, %v425_v21 }
 0x25a   :  { %v440_v24 = vadd.f32 %v433_v23, %v432_v22 }
 0x25c   :  { %441 = vadd.xlane.f32.xlu1 %v440_v24  ;;  %444 = vadd.xlane.f32.xlu0 %v443_v25  ;;  %v1647_v25 = vld [vmem:[%s1829_s5 + $0x8] sm:$0xff] }
 0x2dd   :  { %v448_v28 = vpop.xlane.xlu1 %447 }
 0x2de   :  { %v454_v31 = vmul.f32 0.00862069, %v448_v28 }
 0x2e0   :  { %v458_v32 = vadd.f32 1e-05, %v454_v31 }
 0x2e1   :  { %v451_v33 = vpop.xlane.xlu0 %450 }
 0x2e2   :  { %1026 = vrsqrt.f32 %v458_v32  ;;  %v455_v34 = vmul.f32 0.00862069, %v451_v33 }
 0x2e4   :  { %v459_v26 = vadd.f32 1e-05, %v455_v34 }
 0x2e5   :  { %v442_v36 = vpop.xlane.xlu1 %441  ;;  %v445_v37 = vpop.xlane.xlu0 %444 }
 0x2e6   :  { %1028 = vrsqrt.f32 %v459_v26  ;;  %v452_v41 = vmul.f32 0.00862069, %v442_v36  ;;  %v453_v42 = vmul.f32 0.00862069, %v445_v37 }
 0x2e8   :  { %v456_v45 = vadd.f32 1e-05, %v452_v41  ;;  %v457_v46 = vadd.f32 1e-05, %v453_v42 }
 0x2ea   :  { %1030 = vrsqrt.f32 %v456_v45 }
 0x2eb   :  { %1032 = vrsqrt.f32 %v457_v46 }
 0x2ef   :  { %v1027_v48 = vpop.eup %1026 }
 0x2f0   :  { %v466_v49 = vmul.f32 %v1027_v48, %v1284_v10 }
 0x2f2   :  { %v470_v50 = vmul.f32 %v466_v49, %v414_v47  ;;  %v1117_v47 = vmov 2  }
 0x2f3   :  { %v1029_v51 = vpop.eup %1028 }
 0x2f4   :  { %480 = vrot.lane.b32.xlu1 %v470_v50, %s1116_s4  ;;  %v467_v54 = vmul.f32 %v1029_v51, %v1279_v9 }
 0x2f6   :  { %v471_v55 = vmul.f32 %v467_v54, %v415_v52 }
 0x2f7   :  { %v1031_v56 = vpop.eup %1030 }
 0x2f8   :  { %v1033_v57 = vpop.eup %1032  ;;  %482 = vrot.lane.b32.xlu0 %v471_v55, %s1116_s4  ;;  %v464_v58 = vmul.f32 %v1031_v56, %v1293_v12 }
 0x2f9   :  { %v465_v59 = vmul.f32 %v1033_v57, %v1298_v13 }
 0x2fa   :  { %v468_v60 = vmul.f32 %v464_v58, %v412_v8 }
 0x2fb   :  { %v469_v61 = vmul.f32 %v465_v59, %v1470_v53 }
 0x2fc   :  { %476 = vrot.lane.b32.xlu0 %v468_v60, %s1116_s4 }
 0x2fd   :  { %478 = vrot.lane.b32.xlu1 %v469_v61, %s1116_s4 }
 0x300   :  { %504 = vperm.xlu0 %1016, %v466_v49  }
 0x301   :  { %509 = vperm.xlu1 %1015, %v467_v54  }
 0x304   :  { %1017 = vset.pattern.permute.xlu0 %v1117_v47 }
 0x305   :  { %499 = vperm.xlu1 %1015, %v465_v59  }
 0x309   :  { %494 = vperm.xlu1 %1015, %v464_v58  }
 0x30d   :  { %1018 = vset.pattern.permute.xlu1 %v1117_v47 }
 0x366   :  { %v481_v52 = vpop.permute.xlu1 %480 }
 0x367   :  { %v490_v62 = vsub.f32 %v1284_v10, %v481_v52 }
 0x369   :  { %532 = vperm.xlu0 %1017, %v490_v62  }
 0x36a   :  { %v483_v63 = vpop.permute.xlu0 %482 }
 0x36b   :  { %v491_v53 = vsub.f32 %v1279_v9, %v483_v63 }
 0x36d   :  { %537 = vperm.xlu1 %1018, %v491_v53  }
 0x36e   :  { %v477_v8 = vpop.permute.xlu0 %476 }
 0x36f   :  { %v479_v14 = vpop.permute.xlu1 %478  ;;  %v488_v17 = vsub.f32 %v1293_v12, %v477_v8 }
 0x370   :  { %v489_v2 = vsub.f32 %v1298_v13, %v479_v14 }
 0x371   :  { %522 = vperm.xlu0 %1017, %v488_v17  }
 0x372   :  { %527 = vperm.xlu1 %1018, %v489_v2  }
 0x375   :  { %1020 = vset.pattern.permute.xlu0 %v1114_v11 }
 0x376   :  { %1019 = vset.pattern.permute.xlu1 %v1114_v11 }
 0x37b   :  { %v505_v10 = vpop.permute.xlu0 %504 }
 0x37c   :  { %v510_v0 = vpop.permute.xlu1 %509 }
 0x380   :  { %v500_v3 = vpop.permute.xlu1 %499 }
 0x384   :  { %v495_v1 = vpop.permute.xlu1 %494 }
 0x385   :  { %v512_v9 = vmul.f32 %v495_v1, %v1464_v44  ;;  %v513_v6 = vmul.f32 %v495_v1, %v1460_v43  ;;  %v514_v43 = vmul.f32 %v500_v3, %v1444_v38  ;;  %v515_v44 = vmul.f32 %v500_v3, %v1440_v35 }
 0x386   :  { %v516_v35 = vmul.f32 %v505_v10, %v1430_v29  ;;  %v517_v38 = vmul.f32 %v505_v10, %v1434_v30  ;;  %v518_v29 = vmul.f32 %v510_v0, %v1448_v39  ;;  %v519_v30 = vmul.f32 %v510_v0, %v1452_v40  ;;  %v69_v39 = vld [vmem:[%s1826_s2 + $0x8] sm:$0xff]  ;;  %v1642_v40 = vld [vmem:[%s1829_s5] sm:$0xff] }
 0x387   :  { %982 = vmatprep.mubr.msk.f32.mxu1 %vm276_vm0, %v69_v39 }
 0x3e4   :  { %v533_v5 = vpop.permute.xlu0 %532 }
 0x3e5   :  { %v1553_v21 = vadd.f32 %v533_v5, %v516_v35  ;;  %v1555_v22 = vadd.f32 %v533_v5, %v517_v38 }
 0x3e8   :  { %v538_v11 = vpop.permute.xlu1 %537 }
 0x3e9   :  { %v1571_v23 = vadd.f32 %v538_v11, %v518_v29  ;;  %v1573_v24 = vadd.f32 %v538_v11, %v519_v30 }
 0x3ec   :  { %v523_v7 = vpop.permute.xlu0 %522 }
 0x3ed   :  { %v1517_v18 = vadd.f32 %v523_v7, %v512_v9  ;;  %v1519_v12 = vadd.f32 %v523_v7, %v513_v6  ;;  %v528_v13 = vpop.permute.xlu1 %527 }
 0x3ee   :  { %v1535_v19 = vadd.f32 %v528_v13, %v514_v43  ;;  %v1537_v20 = vadd.f32 %v528_v13, %v515_v44 }
 0x3ef   :  { %604 = vrot.lane.b32.xlu0 %v1519_v12, %s1108_s0  ;;  %596 = vrot.lane.b32.xlu1 %v1517_v18, %s1108_s0 }
 0x3f3   :  { %580 = vrot.lane.b32.xlu0 %v1519_v12, %s1109_s1  ;;  %572 = vrot.lane.b32.xlu1 %v1517_v18, %s1109_s1 }
 0x3f7   :  { %556 = vrot.lane.b32.xlu0 %v1519_v12, %s1110_s9  ;;  %548 = vrot.lane.b32.xlu1 %v1517_v18, %s1110_s9 }
 0x3fb   :  { %606 = vrot.lane.b32.xlu0 %v1537_v20, %s1108_s0  ;;  %598 = vrot.lane.b32.xlu1 %v1535_v19, %s1108_s0 }
 0x3ff   :  { %582 = vrot.lane.b32.xlu0 %v1537_v20, %s1109_s1  ;;  %574 = vrot.lane.b32.xlu1 %v1535_v19, %s1109_s1 }
 0x403   :  { %558 = vrot.lane.b32.xlu0 %v1537_v20, %s1110_s9  ;;  %550 = vrot.lane.b32.xlu1 %v1535_v19, %s1110_s9 }
 0x407   :  { %608 = vrot.lane.b32.xlu0 %v1555_v22, %s1108_s0  ;;  %600 = vrot.lane.b32.xlu1 %v1553_v21, %s1108_s0 }
 0x40b   :  { %584 = vrot.lane.b32.xlu0 %v1555_v22, %s1109_s1  ;;  %576 = vrot.lane.b32.xlu1 %v1553_v21, %s1109_s1 }
 0x40f   :  { %560 = vrot.lane.b32.xlu0 %v1555_v22, %s1110_s9  ;;  %552 = vrot.lane.b32.xlu1 %v1553_v21, %s1110_s9 }
 0x413   :  { %610 = vrot.lane.b32.xlu0 %v1573_v24, %s1108_s0  ;;  %602 = vrot.lane.b32.xlu1 %v1571_v23, %s1108_s0  ;;  %s1121_s0 = smov [#allocation7]  }
 0x417   :  { %680 = vrot.lane.b32.xlu0 %v1555_v22, %s1111_s10  ;;  %672 = vrot.lane.b32.xlu1 %v1553_v21, %s1111_s10 }
 0x41b   :  { %586 = vrot.lane.b32.xlu0 %v1573_v24, %s1109_s1  ;;  %578 = vrot.lane.b32.xlu1 %v1571_v23, %s1109_s1  ;;  %s968_s1 = sshll.u32 %s1121_s0, 4  ;;  %s969_s1 = int_to_ptr.vmem [resolvable:$true] %s968_s1 }
 0x41c   :  { %p1083_p11 = scmp.lt.s32.totalorder %s969_s1, %s969_s1 }
 0x41f   :  { %678 = vrot.lane.b32.xlu0 %v1537_v20, %s1111_s10  ;;  %670 = vrot.lane.b32.xlu1 %v1535_v19, %s1111_s10 }
 0x423   :  { %562 = vrot.lane.b32.xlu0 %v1573_v24, %s1110_s9  ;;  %554 = vrot.lane.b32.xlu1 %v1571_v23, %s1110_s9  ;;  %s1078_s9 = scalar_lea.vmem %s969_s1, 32 }
 0x424   :  { %p1079_p10 = scmp.ne.s32.totalorder %s969_s1, %s1078_s9  ;;  %p1084_p12 = scmp.lt.s32.totalorder %s1078_s9, %s1078_s9 }
 0x426   :  { %p1085_p13 = por %p1084_p12, %p1083_p11 }
 0x427   :  { %676 = vrot.lane.b32.xlu0 %v1519_v12, %s1111_s10  ;;  %668 = vrot.lane.b32.xlu1 %v1517_v18, %s1111_s10 }
 0x428   :  { %p1086_p0 = pnand %p1085_p13, %p1079_p10 }
 0x42b   :  { %656 = vrot.lane.b32.xlu0 %v1555_v22, %s1112_s11  ;;  %648 = vrot.lane.b32.xlu1 %v1553_v21, %s1112_s11 }
 0x42f   :  { %654 = vrot.lane.b32.xlu0 %v1537_v20, %s1112_s11  ;;  %646 = vrot.lane.b32.xlu1 %v1535_v19, %s1112_s11 }
 0x433   :  { %682 = vrot.lane.b32.xlu0 %v1573_v24, %s1111_s10  ;;  %674 = vrot.lane.b32.xlu1 %v1571_v23, %s1111_s10 }
 0x437   :  { %652 = vrot.lane.b32.xlu0 %v1519_v12, %s1112_s11  ;;  %644 = vrot.lane.b32.xlu1 %v1517_v18, %s1112_s11 }
 0x43b   :  { %658 = vrot.lane.b32.xlu0 %v1573_v24, %s1112_s11  ;;  %650 = vrot.lane.b32.xlu1 %v1571_v23, %s1112_s11 }
 0x43f   :  { %632 = vrot.lane.b32.xlu0 %v1555_v22, %s1113_s12  ;;  %624 = vrot.lane.b32.xlu1 %v1553_v21, %s1113_s12 }
 0x443   :  { %634 = vrot.lane.b32.xlu0 %v1573_v24, %s1113_s12  ;;  %626 = vrot.lane.b32.xlu1 %v1571_v23, %s1113_s12 }
 0x447   :  { %630 = vrot.lane.b32.xlu0 %v1537_v20, %s1113_s12  ;;  %622 = vrot.lane.b32.xlu1 %v1535_v19, %s1113_s12 }
 0x44b   :  { %628 = vrot.lane.b32.xlu0 %v1519_v12, %s1113_s12  ;;  %620 = vrot.lane.b32.xlu1 %v1517_v18, %s1113_s12 }
 0x44f   :  { %694 = vperm.xlu0 %1020, %v1642_v40   ;;  %699 = vperm.xlu1 %1019, %v1647_v25  }
 0x453   :  { %1022 = vset.pattern.permute.xlu0 %v1115_v27  ;;  %1021 = vset.pattern.permute.xlu1 %v1115_v27 }
 0x461   :  { %v605_v28 = vpop.permute.xlu0 %604  ;;  %v597_v31 = vpop.permute.xlu1 %596 }
 0x462   :  { %v616_v53 = vsel %vm172_vm1, %v605_v28, %v597_v31  ;;  %v612_v17 = vsel %vm172_vm1, %v597_v31, %v605_v28 }
 0x465   :  { %v581_v32 = vpop.permute.xlu0 %580  ;;  %v573_v33 = vpop.permute.xlu1 %572 }
 0x466   :  { %v592_v7 = vsel %vm147_vm2, %v581_v32, %v573_v33  ;;  %v588_v43 = vsel %vm147_vm2, %v573_v33, %v581_v32 }
 0x469   :  { %v1653_v34 = vpop.permute.xlu0 %556  ;;  %v1655_v26 = vpop.permute.xlu1 %548 }
 0x46a   :  { %v568_v32 = vsel %vm122_vm3, %v1653_v34, %v1655_v26 }
 0x46d   :  { %v607_v36 = vpop.permute.xlu0 %606  ;;  %v599_v37 = vpop.permute.xlu1 %598 }
 0x46e   :  { %v617_v62 = vsel %vm172_vm1, %v607_v36, %v599_v37  ;;  %v613_v63 = vsel %vm172_vm1, %v599_v37, %v607_v36  ;;  %v564_v37 = vsel %vm122_vm3, %v1655_v26, %v1653_v34 }
 0x471   :  { %v583_v41 = vpop.permute.xlu0 %582  ;;  %v575_v42 = vpop.permute.xlu1 %574 }
 0x472   :  { %v593_v9 = vsel %vm147_vm2, %v583_v41, %v575_v42  ;;  %v589_v6 = vsel %vm147_vm2, %v575_v42, %v583_v41 }
 0x475   :  { %v1657_v45 = vpop.permute.xlu0 %558  ;;  %v551_v46 = vpop.permute.xlu1 %550 }
 0x476   :  { %v569_v28 = vsel %vm122_vm3, %v1657_v45, %v551_v46  ;;  %v565_v31 = vsel %vm122_vm3, %v551_v46, %v1657_v45 }
 0x479   :  { %v609_v48 = vpop.permute.xlu0 %608  ;;  %v601_v49 = vpop.permute.xlu1 %600 }
 0x47a   :  { %v618_v59 = vsel %vm172_vm1, %v609_v48, %v601_v49  ;;  %v614_v52 = vsel %vm172_vm1, %v601_v49, %v609_v48 }
 0x47d   :  { %v585_v50 = vpop.permute.xlu0 %584  ;;  %v577_v51 = vpop.permute.xlu1 %576 }
 0x47e   :  { %v594_v3 = vsel %vm147_vm2, %v585_v50, %v577_v51  ;;  %v590_v5 = vsel %vm147_vm2, %v577_v51, %v585_v50 }
 0x481   :  { %v561_v27 = vpop.permute.xlu0 %560  ;;  %v553_v54 = vpop.permute.xlu1 %552 }
 0x482   :  { %v570_v38 = vsel %vm122_vm3, %v561_v27, %v553_v54  ;;  %v566_v39 = vsel %vm122_vm3, %v553_v54, %v561_v27 }
 0x485   :  { %v611_v55 = vpop.permute.xlu0 %610  ;;  %v603_v56 = vpop.permute.xlu1 %602 }
 0x486   :  { %v619_v57 = vsel %vm172_vm1, %v611_v55, %v603_v56  ;;  %v615_v58 = vsel %vm172_vm1, %v603_v56, %v611_v55 }
 0x487   :  { %708 = vmatprep.subr.mxu1 %v619_v57 }
 0x488   :  { %709 = vmatpush1.msra.mxu1 %v615_v58 }
 0x489   :  { %v1665_v60 = vpop.permute.xlu0 %680  ;;  %710 = vmatprep.subr.mxu1 %v618_v59  ;;  %v1667_v61 = vpop.permute.xlu1 %672 }
 0x48a   :  { %711 = vmatpush1.msra.mxu1 %v614_v52 }
 0x48b   :  { %712 = vmatprep.subr.mxu1 %v617_v62 }
 0x48c   :  { %713 = vmatpush1.msra.mxu1 %v613_v63 }
 0x48d   :  { %v587_v8 = vpop.permute.xlu0 %586  ;;  %714 = vmatprep.subr.mxu1 %v616_v53  ;;  %v579_v14 = vpop.permute.xlu1 %578 }
 0x48e   :  { %715 = vmatpush1.msra.mxu1 %v612_v17  ;;  %v595_v2 = vsel %vm147_vm2, %v587_v8, %v579_v14  ;;  %v591_v0 = vsel %vm147_vm2, %v579_v14, %v587_v8 }
 0x48f   :  { %716 = vmatprep.subr.mxu1 %v595_v2 }
 0x490   :  { %717 = vmatpush1.msra.mxu1 %v591_v0 }
 0x491   :  { %v679_v10 = vpop.permute.xlu0 %678  ;;  %718 = vmatprep.subr.mxu1 %v594_v3  ;;  %v671_v1 = vpop.permute.xlu1 %670 }
 0x492   :  { %719 = vmatpush1.msra.mxu1 %v590_v5 }
 0x493   :  { %720 = vmatprep.subr.mxu1 %v593_v9  ;;  %v68_v9 = vld [vmem:[%s1826_s2] sm:$0xff] }
 0x494   :  { %721 = vmatpush1.msra.mxu1 %v589_v6  ;;  %v71_v6 = vld [vmem:[%s1826_s2 + $0x18] sm:$0xff] }
 0x495   :  { %v563_v11 = vpop.permute.xlu0 %562  ;;  %722 = vmatprep.subr.mxu1 %v592_v7  ;;  %v555_v13 = vpop.permute.xlu1 %554  ;;  %v70_v7 = vld [vmem:[%s1826_s2 + $0x10] sm:$0xff] }
 0x496   :  { %723 = vmatpush1.msra.mxu1 %v588_v43  ;;  %v571_v44 = vsel %vm122_vm3, %v563_v11, %v555_v13  ;;  %v567_v35 = vsel %vm122_vm3, %v555_v13, %v563_v11 }
 0x497   :  { %724 = vmatprep.subr.mxu1 %v571_v44 }
 0x498   :  { %725 = vmatpush1.msra.mxu1 %v567_v35 }
 0x499   :  { %v677_v29 = vpop.permute.xlu0 %676  ;;  %726 = vmatprep.subr.mxu1 %v570_v38  ;;  %v669_v30 = vpop.permute.xlu1 %668 }
 0x49a   :  { %727 = vmatpush1.msra.mxu1 %v566_v39  ;;  %v688_v34 = vsel %vm247_vm4, %v677_v29, %v669_v30  ;;  %v684_v49 = vsel %vm247_vm4, %v669_v30, %v677_v29 }
 0x49b   :  { %728 = vmatprep.subr.mxu1 %v569_v28 }
 0x49c   :  { %729 = vmatpush1.msra.mxu1 %v565_v31 }
 0x49d   :  { %v657_v33 = vpop.permute.xlu0 %656  ;;  %730 = vmatprep.subr.mxu1 %v568_v32  ;;  %v649_v36 = vpop.permute.xlu1 %648 }
 0x49e   :  { %731 = vmatpush1.msra.mxu1 %v564_v37  ;;  %v666_v27 = vsel %vm222_vm5, %v657_v33, %v649_v36  ;;  %v662_v56 = vsel %vm222_vm5, %v649_v36, %v657_v33 }
 0x49f   :  { %732 = vmatprep.subr.mxu1 %v1573_v24 }
 0x4a0   :  { %733 = vmatpush1.msra.mxu1 %v1571_v23 }
 0x4a1   :  { %v655_v41 = vpop.permute.xlu0 %654  ;;  %734 = vmatprep.subr.mxu1 %v1555_v22  ;;  %v647_v42 = vpop.permute.xlu1 %646  ;;  %v685_v22 = vsel %vm247_vm4, %v671_v1, %v679_v10 }
 0x4a2   :  { %735 = vmatpush1.msra.mxu1 %v1553_v21  ;;  %v665_v57 = vsel %vm222_vm5, %v655_v41, %v647_v42  ;;  %v661_v58 = vsel %vm222_vm5, %v647_v42, %v655_v41 }
 0x4a3   :  { %736 = vmatprep.subr.mxu1 %v1537_v20  ;;  %v690_v20 = vsel %vm247_vm4, %v1665_v60, %v1667_v61 }
 0x4a4   :  { %737 = vmatpush1.msra.mxu1 %v1535_v19 }
 0x4a5   :  { %v683_v45 = vpop.permute.xlu0 %682  ;;  %738 = vmatprep.subr.mxu1 %v1519_v12  ;;  %v675_v46 = vpop.permute.xlu1 %674  ;;  %v689_v12 = vsel %vm247_vm4, %v679_v10, %v671_v1 }
 0x4a6   :  { %739 = vmatpush1.msra.mxu1 %v1517_v18  ;;  %v691_v24 = vsel %vm247_vm4, %v683_v45, %v675_v46  ;;  %v687_v23 = vsel %vm247_vm4, %v675_v46, %v683_v45  ;;  %v686_v18 = vsel %vm247_vm4, %v1667_v61, %v1665_v60 }
 0x4a7   :  { %748 = vmatprep.subr.mxu1 %v691_v24 }
 0x4a8   :  { %749 = vmatpush2.msra.mxu1 %v687_v23 }
 0x4a9   :  { %v653_v19 = vpop.permute.xlu0 %652  ;;  %750 = vmatprep.subr.mxu1 %v690_v20  ;;  %v645_v21 = vpop.permute.xlu1 %644 }
 0x4aa   :  { %751 = vmatpush2.msra.mxu1 %v686_v18  ;;  %v664_v59 = vsel %vm222_vm5, %v653_v19, %v645_v21  ;;  %v660_v52 = vsel %vm222_vm5, %v645_v21, %v653_v19 }
 0x4ab   :  { %752 = vmatprep.subr.mxu1 %v689_v12 }
 0x4ac   :  { %753 = vmatpush2.msra.mxu1 %v685_v22 }
 0x4ad   :  { %v659_v26 = vpop.permute.xlu0 %658  ;;  %754 = vmatprep.subr.mxu1 %v688_v34  ;;  %v651_v48 = vpop.permute.xlu1 %650 }
 0x4ae   :  { %755 = vmatpush2.msra.mxu1 %v684_v49  ;;  %v667_v50 = vsel %vm222_vm5, %v659_v26, %v651_v48  ;;  %v663_v51 = vsel %vm222_vm5, %v651_v48, %v659_v26 }
 0x4af   :  { %756 = vmatprep.subr.mxu1 %v667_v50 }
 0x4b0   :  { %757 = vmatpush2.msra.mxu1 %v663_v51 }
 0x4b1   :  { %v633_v54 = vpop.permute.xlu0 %632  ;;  %758 = vmatprep.subr.mxu1 %v666_v27  ;;  %v625_v55 = vpop.permute.xlu1 %624 }
 0x4b2   :  { %759 = vmatpush2.msra.mxu1 %v662_v56  ;;  %v642_v53 = vsel %vm197_vm6, %v633_v54, %v625_v55  ;;  %v638_v17 = vsel %vm197_vm6, %v625_v55, %v633_v54 }
 0x4b3   :  { %760 = vmatprep.subr.mxu1 %v665_v57 }
 0x4b4   :  { %761 = vmatpush2.msra.mxu1 %v661_v58 }
 0x4b5   :  { %v635_v60 = vpop.permute.xlu0 %634  ;;  %762 = vmatprep.subr.mxu1 %v664_v59  ;;  %v627_v61 = vpop.permute.xlu1 %626 }
 0x4b6   :  { %763 = vmatpush2.msra.mxu1 %v660_v52  ;;  %v643_v62 = vsel %vm197_vm6, %v635_v60, %v627_v61  ;;  %v639_v63 = vsel %vm197_vm6, %v627_v61, %v635_v60 }
 0x4b7   :  { %764 = vmatprep.subr.mxu1 %v643_v62 }
 0x4b8   :  { %765 = vmatpush2.msra.mxu1 %v639_v63 }
 0x4b9   :  { %v631_v8 = vpop.permute.xlu0 %630  ;;  %766 = vmatprep.subr.mxu1 %v642_v53  ;;  %v623_v14 = vpop.permute.xlu1 %622 }
 0x4ba   :  { %767 = vmatpush2.msra.mxu1 %v638_v17  ;;  %v641_v2 = vsel %vm197_vm6, %v631_v8, %v623_v14  ;;  %v637_v0 = vsel %vm197_vm6, %v623_v14, %v631_v8 }
 0x4bb   :  { %768 = vmatprep.subr.mxu1 %v641_v2  ;;  %v1118_v2 = vmov 0.0  }
 0x4bc   :  { %769 = vmatpush2.msra.mxu1 %v637_v0 }
 0x4bd   :  { %v629_v3 = vpop.permute.xlu0 %628  ;;  %v621_v10 = vpop.permute.xlu1 %620 }
 0x4be   :  { %v640_v1 = vsel %vm197_vm6, %v629_v3, %v621_v10  ;;  %v636_v5 = vsel %vm197_vm6, %v621_v10, %v629_v3 }
 0x4bf   :  { %770 = vmatprep.subr.mxu1 %v640_v1  ;;  %v1120_v1 = vmov 3  }
 0x4c0   :  { %771 = vmatpush2.msra.mxu1 %v636_v5 }
 0x4c1   :  { %773 = vmatmul.mubr.f32.vlgmr.msra.gmra.mxu1 %v68_v9  ;;  %988 = vmatprep.subr.mxu1 %v1118_v2 }
 0x4c2   :  { %983 = vmatprep.mubr.msk.f32.mxu1 %vm276_vm0, %v71_v6 }
 0x4c5   :  { %779 = vmatmul.mubr.f32.gmra.mxu1 %v70_v7 }
 0x4c6   :  { %992 = vmatprep.mubr.msk.f32.mxu1 %vm1119_vm11, %v1118_v2 }
 0x4ca   :  { %v695_v11 = vpop.permute.xlu0 %694  ;;  %v700_v35 = vpop.permute.xlu1 %699 }
 0x581   :  { %v774_v13 = vpop.f32.mrf.mxu1 }
 0x582   :  { %v775_v43 = vadd.f32 %v774_v13, %v695_v11 }
 0x583   :  { %v776_v44 = vpop.f32.mrf.mxu1 }
 0x584   :  { %v785_v38 = vmax.f32 %v775_v43, 0.0  ;;  %v777_v29 = vadd.f32 %v776_v44, %v695_v11 }
 0x585   :  { %v780_v39 = vpop.f32.mrf.mxu1 }
 0x586   :  { %v786_v28 = vmax.f32 %v777_v29, 0.0  ;;  %v781_v31 = vadd.f32 %v780_v39, %v700_v35  ;;  %v795_v33 = vsel %vm789_vm9, %v785_v38, 0.0 }
 0x587   :  { %v782_v32 = vpop.f32.mrf.mxu1 }
 0x588   :  { %v796_v36 = vsel %vm1790_vm10, %v786_v28, 0.0  ;;  %v787_v37 = vmax.f32 %v781_v31, 0.0  ;;  %v783_v41 = vadd.f32 %v782_v32, %v700_v35 }
 0x589   :  { %v799_v42 = vadd.f32 %v796_v36, %v795_v33 }
 0x58a   :  { %v788_v45 = vmax.f32 %v783_v41, 0.0  ;;  %v797_v16 = vsel %vm789_vm9, %v787_v37, 0.0 }
 0x58b   :  { %800 = vadd.xlane.f32.xlu0 %v799_v42 }
 0x58c   :  { %v798_v4 = vsel %vm1790_vm10, %v788_v45, 0.0 }
 0x58d   :  { %v802_v46 = vadd.f32 %v798_v4, %v797_v16 }
 0x58f   :  { %803 = vadd.xlane.f32.xlu1 %v802_v46 }
 0x614   :  { %v801_v24 = vpop.xlane.xlu0 %800 }
 0x615   :  { %v805_v23 = vmul.f32 0.009615385, %v801_v24 }
 0x617   :  { %v807_v20 = vsub.f32 %v795_v33, %v805_v23  ;;  %v808_v19 = vsub.f32 %v796_v36, %v805_v23 }
 0x618   :  { %v804_v21 = vpop.xlane.xlu1 %803 }
 0x619   :  { %v806_v18 = vmul.f32 0.009615385, %v804_v21  ;;  %v811_v12 = vsel %vm789_vm9, %v807_v20, 0.0  ;;  %v812_v22 = vsel %vm1790_vm10, %v808_v19, 0.0 }
 0x61a   :  { %v815_v34 = vmul.f32 %v811_v12, %v811_v12  ;;  %v816_v26 = vmul.f32 %v812_v22, %v812_v22 }
 0x61b   :  { %v809_v48 = vsub.f32 %v797_v16, %v806_v18  ;;  %v810_v49 = vsub.f32 %v798_v4, %v806_v18 }
 0x61c   :  { %v819_v50 = vadd.f32 %v816_v26, %v815_v34 }
 0x61d   :  { %v813_v51 = vsel %vm789_vm9, %v809_v48, 0.0  ;;  %v814_v27 = vsel %vm1790_vm10, %v810_v49, 0.0 }
 0x61e   :  { %820 = vadd.xlane.f32.xlu0 %v819_v50  ;;  %v817_v54 = vmul.f32 %v813_v51, %v813_v51  ;;  %v818_v55 = vmul.f32 %v814_v27, %v814_v27 }
 0x620   :  { %v822_v56 = vadd.f32 %v818_v55, %v817_v54 }
 0x622   :  { %823 = vadd.xlane.f32.xlu1 %v822_v56 }
 0x6a7   :  { %v821_v57 = vpop.xlane.xlu0 %820 }
 0x6a8   :  { %v825_v58 = vmul.f32 0.009615385, %v821_v57 }
 0x6aa   :  { %v827_v59 = vadd.f32 1e-05, %v825_v58 }
 0x6ab   :  { %v824_v60 = vpop.xlane.xlu1 %823 }
 0x6ac   :  { %1034 = vrsqrt.f32 %v827_v59  ;;  %v826_v61 = vmul.f32 0.009615385, %v824_v60 }
 0x6ae   :  { %v828_v52 = vadd.f32 1e-05, %v826_v61 }
 0x6b0   :  { %1036 = vrsqrt.f32 %v828_v52 }
 0x6b9   :  { %v1035_v62 = vpop.eup %1034 }
 0x6ba   :  { %v831_v15 = vmul.f32 %v1035_v62, %v1642_v40 }
 0x6bc   :  { %v833_v63 = vmul.f32 %v831_v15, %v805_v23 }
 0x6bd   :  { %v1037_v53 = vpop.eup %1036 }
 0x6be   :  { %837 = vrot.lane.b32.xlu0 %v833_v63, %s1116_s4  ;;  %v832_v8 = vmul.f32 %v1037_v53, %v1647_v25 }
 0x6c0   :  { %v834_v14 = vmul.f32 %v832_v8, %v806_v18 }
 0x6c2   :  { %839 = vrot.lane.b32.xlu1 %v834_v14, %s1116_s4 }
 0x6dd   :  { %851 = vadd.xlane.f32.xlu0 %v798_v4 }
 0x6e1   :  { %849 = vadd.xlane.f32.xlu0 %v796_v36 }
 0x6e6   :  { %847 = vadd.xlane.f32.xlu1 %v797_v16 }
 0x6ea   :  { %845 = vadd.xlane.f32.xlu1 %v795_v33 }
 0x6f7   :  { %860 = vperm.xlu0 %1022, %v831_v15  }
 0x6fb   :  { %865 = vperm.xlu1 %1021, %v832_v8   ;;  %1025 = vset.pattern.permute.xlu0 %v1120_v1 }
 0x6ff   :  { %1023 = vset.pattern.permute.xlu1 %v1117_v47 }
 0x730   :  { %v838_v3 = vpop.permute.xlu0 %837 }
 0x731   :  { %v843_v10 = vsub.f32 %v1642_v40, %v838_v3 }
 0x734   :  { %v840_v17 = vpop.permute.xlu1 %839 }
 0x735   :  { %v844_v0 = vsub.f32 %v1647_v25, %v840_v17 }
 0x737   :  { %877 = vperm.xlu1 %1023, %v844_v0  }
 0x73b   :  { %872 = vperm.xlu1 %1023, %v843_v10  }
 0x73f   :  { %1024 = vset.pattern.permute.xlu1 %v1120_v1 }
 0x740   :  { %883 = vperm.xlu1 %1024, %v1642_v40   ;;  %v72_v40 = vld [vmem:[%s1827_s3] sm:$0x3] }
 0x766   :  { %v852_v9 = vpop.xlane.xlu0 %851 }
 0x76a   :  { %v850_v7 = vpop.xlane.xlu0 %849 }
 0x76f   :  { %v848_v5 = vpop.xlane.xlu1 %847 }
 0x770   :  { %v855_v6 = vsel %vm853_vm12, %v848_v5, %v852_v9 }
 0x771   :  { %v857_v13 = vmul.f32 0.01923077, %v855_v6 }
 0x772   :  { %v861_v29 = vpop.permute.xlu0 %860 }
 0x773   :  { %v846_v47 = vpop.xlane.xlu1 %845 }
 0x774   :  { %v854_v11 = vsel %vm853_vm12, %v846_v47, %v850_v7 }
 0x775   :  { %v856_v43 = vmul.f32 0.01923077, %v854_v11 }
 0x777   :  { %v866_v25 = vpop.permute.xlu1 %865  ;;  %v868_v30 = vmul.f32 %v861_v29, %v856_v43 }
 0x778   :  { %v869_v44 = vmul.f32 %v866_v25, %v857_v13 }
 0x7b2   :  { %v878_v35 = vpop.permute.xlu1 %877 }
 0x7b3   :  { %v881_v38 = vadd.f32 %v878_v35, %v869_v44 }
 0x7b5   :  { %989 = vmatpush3.msra.mxu1 %v881_v38 }
 0x7b6   :  { %v873_v39 = vpop.permute.xlu1 %872  ;;  %990 = vmatprep.subr.mxu1 %v1118_v2 }
 0x7b7   :  { %v880_v28 = vadd.f32 %v873_v39, %v868_v30 }
 0x7b9   :  { %991 = vmatpush3.msra.mxu1 %v880_v28 }
 0x7ba   :  { %993 = vmatmul.mubr.msk.f32.vlgmr.msra.gmra.mxu1 %vm886_vm13, %v72_v40 }
 0x7bb   :  { %v884_v31 = vpop.permute.xlu1 %883 }
 0x87a   :  { %v956_v32 = vpop.f32.mrf.mxu1 }
 0x87b   :  { %v957_v33 = vadd.f32 %v956_v32, %v884_v31 }
 0x87c   :  { %v994_v36 = vpop.f32.mrf.mxu1 }
 0x87d   :  { %961 = vst.msk [vmem:[#allocation7] sm:$0x3] %vm960_vm14, %v957_v33 }
 0x87e   :  { %1089 = shalt.err (!%p1086_p0)
}
 0x87f   :  { %971 = dma.vmem_to_hbm [thread:$0]  %s969_s1, 32, %s1830_s6, [#allocation4]  }
 0x880   :  { %1102 = dma.done.wait [#allocation4], 32  }
 0x881   :  { %1103 = vsyncadd [#allocation4], 4294967264 }
 0x882   :  { %975 = vsyncpa [#allocation3], 1 }
 0x883   :  { %976 = vsyncpa [#allocation6], 1 }
 0x884   :  { %977 = vsyncpa [#allocation4], 1 }

</bundles_post_ra>
